<compile_context>
chip_gen: v7x
topology: tpu7x:2x2x1
jax: 0.10.0
libtpu: 0.0.40
codegen_flags: <defaults>
</compile_context>

<pallas_src>
import functools

import jax
import jax.numpy as jnp
from jax.experimental import pallas as pl
from jax.experimental.pallas import tpu as pltpu


H1, H2 = 64, 32  # hidden widths of the value head


def value_net_kernel(x_ref, w1_ref, b1_ref, w2_ref, b2_ref, w3r_ref, b3_ref, o_ref):
    x = x_ref[...]
    # Layer 1: Linear(D, 64) + ReLU  (MXU)
    h1 = jnp.dot(x, w1_ref[...], preferred_element_type=jnp.float32) + b1_ref[...]
    h1 = jnp.maximum(h1, 0.0)
    # Layer 2: Linear(64, 32) + ReLU  (MXU)
    h2 = jnp.dot(h1, w2_ref[...], preferred_element_type=jnp.float32) + b2_ref[...]
    h2 = jnp.maximum(h2, 0.0)
    # Layer 3: Linear(32, 1) — N=1 would waste the MXU; do VPU multiply + lane reduce.
    v = jnp.sum(h2 * w3r_ref[...], axis=-1, keepdims=True) + b3_ref[...]
    o_ref[...] = v.astype(o_ref.dtype)


def _round_up(n, m):
    return ((n + m - 1) // m) * m


@functools.partial(jax.jit, static_argnames=("tile_b",))
def value_network_forward(x, params, *, tile_b=512):
    """x: [B, D] float32. params: dict w1,b1,w2,b2,w3,b3 (weights stored [in, out]).
    Returns [B, 1] float32."""
    w1, b1 = params["w1"], params["b1"]
    w2, b2 = params["w2"], params["b2"]
    w3, b3 = params["w3"], params["b3"]
    w3_row = w3.reshape(1, H2)  # [1, 32] broadcast row for the VPU reduction path

    B, D = x.shape
    # Tile sizing: multiple of 8 sublanes; don't over-tile tiny batches.
    tb = min(int(tile_b), _round_up(B, 8))
    tb = _round_up(tb, 8)
    Bp = _round_up(B, tb)
    if Bp != B:
        # Zero-pad so every tile is full — padded rows produce values that are
        # simply sliced off; no garbage reads feed real outputs.
        x = jnp.pad(x, ((0, Bp - B), (0, 0)))

    grid = (Bp // tb,)

    resident = lambda a: pl.BlockSpec(a.shape, lambda i: (0, 0))  # VMEM-resident across grid

    flops = 2 * B * (D * H1 + H1 * H2 + H2)
    bytes_accessed = 4 * (B * D + B + D * H1 + H1 + H1 * H2 + H2 + H2 + 1)

    out_padded = pl.pallas_call(
        value_net_kernel,
        out_shape=jax.ShapeDtypeStruct((Bp, 1), x.dtype),
        grid=grid,
        in_specs=[
            pl.BlockSpec((tb, D), lambda i: (i, 0)),   # x: batch-tiled, double-buffered
            resident(w1), resident(b1),
            resident(w2), resident(b2),
            resident(w3_row), resident(b3),
        ],
        out_specs=pl.BlockSpec((tb, 1), lambda i: (i, 0)),
        compiler_params=pltpu.CompilerParams(
            dimension_semantics=("parallel",),         # v7x: shard batch grid across both TCs
        ),
        cost_estimate=pl.CostEstimate(
            flops=flops, transcendentals=0, bytes_accessed=bytes_accessed),
    )(x, w1, b1, w2, b2, w3_row, b3)

    return out_padded[:B]


def init_params(key, input_dim):
    """Deterministic init mimicking PyTorch's default Linear init:
    U(-1/sqrt(fan_in), 1/sqrt(fan_in)) for weights and biases."""
    dims = [(input_dim, H1), (H1, H2), (H2, 1)]
    params = {}
    for i, (fan_in, fan_out) in enumerate(dims, start=1):
        key, kw, kb = jax.random.split(key, 3)
        bound = 1.0 / jnp.sqrt(float(fan_in))
        params[f"w{i}"] = jax.random.uniform(
            kw, (fan_in, fan_out), jnp.float32, -bound, bound)
        params[f"b{i}"] = jax.random.uniform(
            kb, (1, fan_out), jnp.float32, -bound, bound)
    return params


def reference_forward(x, params):
    h1 = jnp.maximum(x @ params["w1"] + params["b1"], 0.0)
    h2 = jnp.maximum(h1 @ params["w2"] + params["b2"], 0.0)
    return h2 @ params["w3"] + params["b3"]


if __name__ == "__main__":
    key = jax.random.PRNGKey(0)
    key, kx1, kx2 = jax.random.split(key, 3)

    input_dim = 32
    params = init_params(key, input_dim)

    # Small case consistent with the module (note: for batches this tiny a plain
    # JAX matmul is faster than any custom kernel; Pallas pays off at B >> 1k).
    x_small = jax.random.normal(kx1, (8, input_dim), dtype=jnp.float32)
    out_small = jax.block_until_ready(value_network_forward(x_small, params))
    ref_small = reference_forward(x_small, params)
    assert out_small.shape == (8, 1)
    assert jnp.allclose(out_small, ref_small, atol=1e-5, rtol=1e-5), "small-batch mismatch"

    # Multi-tile case: exercises the batch grid, weight residency, and tail padding.
    x_big = jax.random.normal(kx2, (300, input_dim), dtype=jnp.float32)
    out_big = jax.block_until_ready(value_network_forward(x_big, params, tile_b=128))
    ref_big = reference_forward(x_big, params)
    assert out_big.shape == (300, 1)
    assert jnp.allclose(out_big, ref_big, atol=1e-5, rtol=1e-5), "tiled-batch mismatch"

    print("KERNEL_OK")
</pallas_src>

<mosaic_0001>
module attributes {stable_mosaic.version = 11 : i64} {
  func.func @value_net_kernel(%arg0: i32, %arg1: memref<8x32xf32, #tpu.memory_space<vmem>>, %arg2: memref<32x64xf32, #tpu.memory_space<vmem>>, %arg3: memref<1x64xf32, #tpu.memory_space<vmem>>, %arg4: memref<64x32xf32, #tpu.memory_space<vmem>>, %arg5: memref<1x32xf32, #tpu.memory_space<vmem>>, %arg6: memref<1x32xf32, #tpu.memory_space<vmem>>, %arg7: memref<1x1xf32, #tpu.memory_space<vmem>>, %arg8: memref<8x1xf32, #tpu.memory_space<vmem>>) attributes {dimension_semantics = [#tpu.dimension_semantics<parallel>], iteration_bounds = array<i64: 1>, scalar_prefetch = 0 : i64, scratch_operands = 0 : i64, tpu.core_type = #tpu.core_type<tc>, window_params = [{transform_indices = @transform_0, window_bounds = array<i64: 8, 32>}, {pipeline_mode = #tpu.pipeline_mode<synchronous>, transform_indices = @transform_1, window_bounds = array<i64: 32, 64>}, {pipeline_mode = #tpu.pipeline_mode<synchronous>, transform_indices = @transform_2, window_bounds = array<i64: 1, 64>}, {pipeline_mode = #tpu.pipeline_mode<synchronous>, transform_indices = @transform_3, window_bounds = array<i64: 64, 32>}, {pipeline_mode = #tpu.pipeline_mode<synchronous>, transform_indices = @transform_4, window_bounds = array<i64: 1, 32>}, {pipeline_mode = #tpu.pipeline_mode<synchronous>, transform_indices = @transform_5, window_bounds = array<i64: 1, 32>}, {pipeline_mode = #tpu.pipeline_mode<synchronous>, transform_indices = @transform_6, window_bounds = array<i64: 1, 1>}, {transform_indices = @transform_7, window_bounds = array<i64: 8, 1>}]} {
    %c0 = arith.constant 0 : index
    %c0_0 = arith.constant 0 : index
    %0 = vector.load %arg1[%c0, %c0_0] : memref<8x32xf32, #tpu.memory_space<vmem>>, vector<8x32xf32>
    %c0_1 = arith.constant 0 : index
    %c0_2 = arith.constant 0 : index
    %1 = vector.load %arg2[%c0_1, %c0_2] : memref<32x64xf32, #tpu.memory_space<vmem>>, vector<32x64xf32>
    %cst = arith.constant dense<0.000000e+00> : vector<8x64xf32>
    %2 = tpu.matmul %0, %1, %cst {dimension_numbers = #tpu.dot_dimension_numbers<[1], [0], [0], [1], [0, 0, 1, 1], [], []>} : vector<8x32xf32>, vector<32x64xf32>, vector<8x64xf32> -> vector<8x64xf32>
    %c0_3 = arith.constant 0 : index
    %c0_4 = arith.constant 0 : index
    %3 = vector.load %arg3[%c0_3, %c0_4] : memref<1x64xf32, #tpu.memory_space<vmem>>, vector<1x64xf32>
    %4 = vector.broadcast %3 : vector<1x64xf32> to vector<8x64xf32>
    %5 = arith.addf %2, %4 : vector<8x64xf32>
    %cst_5 = arith.constant 0.000000e+00 : f32
    %6 = vector.broadcast %cst_5 : f32 to vector<8x64xf32>
    %7 = arith.maximumf %5, %6 : vector<8x64xf32>
    %c0_6 = arith.constant 0 : index
    %c0_7 = arith.constant 0 : index
    %8 = vector.load %arg4[%c0_6, %c0_7] : memref<64x32xf32, #tpu.memory_space<vmem>>, vector<64x32xf32>
    %cst_8 = arith.constant dense<0.000000e+00> : vector<8x32xf32>
    %9 = tpu.matmul %7, %8, %cst_8 {dimension_numbers = #tpu.dot_dimension_numbers<[1], [0], [0], [1], [0, 0, 1, 1], [], []>} : vector<8x64xf32>, vector<64x32xf32>, vector<8x32xf32> -> vector<8x32xf32>
    %c0_9 = arith.constant 0 : index
    %c0_10 = arith.constant 0 : index
    %10 = vector.load %arg5[%c0_9, %c0_10] : memref<1x32xf32, #tpu.memory_space<vmem>>, vector<1x32xf32>
    %11 = vector.broadcast %10 : vector<1x32xf32> to vector<8x32xf32>
    %12 = arith.addf %9, %11 : vector<8x32xf32>
    %cst_11 = arith.constant 0.000000e+00 : f32
    %13 = vector.broadcast %cst_11 : f32 to vector<8x32xf32>
    %14 = arith.maximumf %12, %13 : vector<8x32xf32>
    %c0_12 = arith.constant 0 : index
    %c0_13 = arith.constant 0 : index
    %15 = vector.load %arg6[%c0_12, %c0_13] : memref<1x32xf32, #tpu.memory_space<vmem>>, vector<1x32xf32>
    %16 = vector.broadcast %15 : vector<1x32xf32> to vector<8x32xf32>
    %17 = arith.mulf %14, %16 : vector<8x32xf32>
    %cst_14 = arith.constant dense<0.000000e+00> : vector<8xf32>
    %18 = vector.multi_reduction <add>, %17, %cst_14 [1] : vector<8x32xf32> to vector<8xf32>
    %19 = vector.shape_cast %18 : vector<8xf32> to vector<8x1xf32>
    %c0_15 = arith.constant 0 : index
    %c0_16 = arith.constant 0 : index
    %20 = vector.load %arg7[%c0_15, %c0_16] : memref<1x1xf32, #tpu.memory_space<vmem>>, vector<1x1xf32>
    %21 = vector.broadcast %20 : vector<1x1xf32> to vector<8x1xf32>
    %22 = arith.addf %19, %21 : vector<8x1xf32>
    %c0_17 = arith.constant 0 : index
    %c0_18 = arith.constant 0 : index
    %23 = vector.load %arg8[%c0_17, %c0_18] : memref<8x1xf32, #tpu.memory_space<vmem>>, vector<8x1xf32>
    tpu.vector_store %arg8[%c0_17, %c0_18], %22 {strides = array<i32>} : memref<8x1xf32, #tpu.memory_space<vmem>>, vector<8x1xf32>,
    return
  }
  func.func @transform_0(%arg0: i32) -> (i32, i32) {
    %c0_i32 = arith.constant 0 : i32
    %c0_i32_0 = arith.constant 0 : i32
    return %arg0, %c0_i32 : i32, i32
  }
  func.func @transform_1(%arg0: i32) -> (i32, i32) {
    %c0_i32 = arith.constant 0 : i32
    %c0_i32_0 = arith.constant 0 : i32
    %c0_i32_1 = arith.constant 0 : i32
    return %c0_i32, %c0_i32_0 : i32, i32
  }
  func.func @transform_2(%arg0: i32) -> (i32, i32) {
    %c0_i32 = arith.constant 0 : i32
    %c0_i32_0 = arith.constant 0 : i32
    %c0_i32_1 = arith.constant 0 : i32
    return %c0_i32, %c0_i32_0 : i32, i32
  }
  func.func @transform_3(%arg0: i32) -> (i32, i32) {
    %c0_i32 = arith.constant 0 : i32
    %c0_i32_0 = arith.constant 0 : i32
    %c0_i32_1 = arith.constant 0 : i32
    return %c0_i32, %c0_i32_0 : i32, i32
  }
  func.func @transform_4(%arg0: i32) -> (i32, i32) {
    %c0_i32 = arith.constant 0 : i32
    %c0_i32_0 = arith.constant 0 : i32
    %c0_i32_1 = arith.constant 0 : i32
    return %c0_i32, %c0_i32_0 : i32, i32
  }
  func.func @transform_5(%arg0: i32) -> (i32, i32) {
    %c0_i32 = arith.constant 0 : i32
    %c0_i32_0 = arith.constant 0 : i32
    %c0_i32_1 = arith.constant 0 : i32
    return %c0_i32, %c0_i32_0 : i32, i32
  }
  func.func @transform_6(%arg0: i32) -> (i32, i32) {
    %c0_i32 = arith.constant 0 : i32
    %c0_i32_0 = arith.constant 0 : i32
    %c0_i32_1 = arith.constant 0 : i32
    return %c0_i32, %c0_i32_0 : i32, i32
  }
  func.func @transform_7(%arg0: i32) -> (i32, i32) {
    %c0_i32 = arith.constant 0 : i32
    %c0_i32_0 = arith.constant 0 : i32
    return %arg0, %c0_i32 : i32, i32
  }
}

</mosaic_0001>

<bundles_post_ra>
// kernel: value_network_forward.1
= control target key start
LH: loop header
LB: loop body
LE: loop exit
PB: predicated region body
PF: predicated region fallthrough
CT: control target
= control target key end

     0   :  { %v301_v0 = vmov 0.0|0.0   ;;  %vm302_vm0 = vmmov 0   ;;  %v303_v4 = vmov 0.0   ;;  %vm40_vm1 = vcmask 261120   ;;  %s400_s1 = inlined_call_operand.vmem [shape: f32[32,64], index: 1, kind: input, shape index: {}]   ;;  %s401_s3 = inlined_call_operand.vmem [shape: f32[64,32], index: 3, kind: input, shape index: {}]   ;;  %s402_s0 = inlined_call_operand.vmem [shape: f32[8,32], index: 0, kind: input, shape index: {}]   ;;  %s403_s2 = inlined_call_operand.vmem [shape: f32[1,64], index: 2, kind: input, shape index: {}]   ;;  %s404_s6 = inlined_call_operand.<no memory space> [shape: f32[1,1], index: 6, kind: input, shape index: {}]   ;;  %s405_s4 = inlined_call_operand.vmem [shape: f32[1,32], index: 4, kind: input, shape index: {}]   ;;  %s406_s5 = inlined_call_operand.vmem [shape: f32[1,32], index: 5, kind: input, shape index: {}]   ;;  %s407_s7 = inlined_call_operand.vmem [shape: f32[8,1], index: 7, kind: output, shape index: {}]  }
   0x1   :  { %280 = vmatprep.subr.bf16.mxu0 %v301_v0  ;;  %v29_v1 = vld [vmem:[%s400_s1] sm:$0xff]  ;;  %v30_v2 = vld [vmem:[%s400_s1 + $0x8] sm:$0xff]  ;;  %v31_v3 = vld [vmem:[%s400_s1 + $0x10] sm:$0xff]  ;;  %258 = vmatprep.mubr.msk.f32.mxu0 %vm302_vm0, %v303_v4  ;;  %vm130_vm2 = vcmask 523264   ;;  %v12_v26 = vstv %s404_s6  ;;  %vm224_vm3 = vcmask 7168  }
   0x2   :  { %v281_v5 = vpack.c.bf16 %v30_v2, %v29_v1  ;;  %v32_v6 = vld [vmem:[%s400_s1 + $0x18] sm:$0xff]  ;;  %286 = vmatprep.subr.bf16.mxu1 %v301_v0  ;;  %v115_v7 = vld [vmem:[%s401_s3] sm:$0xff]  ;;  %277 = vmatprep.mubr.msk.f32.mxu1 %vm302_vm0, %v303_v4  ;;  %v116_v8 = vld [vmem:[%s401_s3 + $0x8] sm:$0xff]  ;;  %13 = vst [vmem:[#allocation2] sm:$0x1] %v12_v26 }
   0x3   :  { %v117_v9 = vld [vmem:[%s401_s3 + $0x10] sm:$0xff]  ;;  %v118_v10 = vld [vmem:[%s401_s3 + $0x18] sm:$0xff]  ;;  %v284_v11 = vpack.c.bf16 %v32_v6, %v31_v3  ;;  %v287_v12 = vpack.c.bf16 %v116_v8, %v115_v7  ;;  %v119_v14 = vld [vmem:[%s401_s3 + $0x20] sm:$0xff] }
   0x4   :  { %282 = vmatpush3.bf16.msra.mxu0 %v281_v5  ;;  %v290_v13 = vpack.c.bf16 %v118_v10, %v117_v9  ;;  %v120_v15 = vld [vmem:[%s401_s3 + $0x28] sm:$0xff]  ;;  %v28_v16 = vld [vmem:[%s402_s0] sm:$0xff]  ;;  %v121_v18 = vld [vmem:[%s401_s3 + $0x30] sm:$0xff] }
   0x5   :  { %283 = vmatprep.subr.bf16.mxu0 %v301_v0  ;;  %288 = vmatpush3.bf16.msra.mxu1 %v287_v12  ;;  %v293_v17 = vpack.c.bf16 %v120_v15, %v119_v14  ;;  %v122_v19 = vld [vmem:[%s401_s3 + $0x38] sm:$0xff]  ;;  %v230_v21 = vld [vmem:[%s403_s2] ss:$0 sm:$0xff] }
   0x6   :  { %289 = vmatprep.subr.bf16.mxu1 %v301_v0  ;;  %v296_v20 = vpack.c.bf16 %v122_v19, %v121_v18  ;;  %v232_v27 = vld [vmem:[%s405_s4] ss:$0 sm:$0xff] }
   0x7   :  { %v234_v31 = vld [vmem:[%s406_s5] ss:$0 sm:$0xff] }
   0x8   :  { %285 = vmatpush3.bf16.msra.mxu0 %v284_v11 }
   0x9   :  { %291 = vmatpush3.bf16.msra.mxu1 %v290_v13  ;;  %v235_v35 = vld [vmem:[#allocation2] ss:$0 sm:$0xff] }
   0xa   :  { %292 = vmatprep.subr.bf16.mxu1 %v301_v0 }
   0xb   :  { %259 = vmatmul.mubr.msk.f32.vlgmr.msra.gmra.mrb[0].mxu0 %vm40_vm1, %v28_v16 }
   0xd   :  { %294 = vmatpush3.bf16.msra.mxu1 %v293_v17 }
   0xe   :  { %295 = vmatprep.subr.bf16.mxu1 %v301_v0 }
  0x11   :  { %297 = vmatpush3.bf16.msra.mxu1 %v296_v20 }
  0xde   :  { %v110_v22 = vpop.f32.mrb[0].mxu0 }
  0xdf   :  { %v111_v23 = vadd.f32 %v230_v21, %v110_v22  ;;  %v260_v24 = vpop.f32.mrb[1].mxu0 }
  0xe1   :  { %v114_v25 = vmax.f32 %v111_v23, 0.0 }
  0xe3   :  { %278 = vmatmul.mubr.msk.f32.vlgmr.msra.gmra.mrb[0].mxu1 %vm130_vm2, %v114_v25 }
 0x1b6   :  { %v200_v28 = vpop.f32.mrb[0].mxu1 }
 0x1b7   :  { %v201_v29 = vadd.f32 %v232_v27, %v200_v28  ;;  %v279_v30 = vpop.f32.mrb[1].mxu1 }
 0x1b9   :  { %v204_v32 = vmax.f32 %v201_v29, 0.0 }
 0x1bb   :  { %v212_v33 = vmul.f32 %v234_v31, %v204_v32 }
 0x1bd   :  { %v213_v34 = vsel %vm40_vm1, %v212_v33, 0.0 }
 0x1be   :  { %214 = vadd.xlane.f32.xlu0 %v213_v34 }
 0x24b   :  { %v215_v36 = vpop.xlane.xlu0 %214 }
 0x24c   :  { %v223_v37 = vadd.f32 %v235_v35, %v215_v36 }
 0x24e   :  { %225 = vst.msk [vmem:[%s407_s7] sm:$0xff] %vm224_vm3, %v223_v37 }

</bundles_post_ra>
